<compile_context>
chip_gen: v5e
topology: v5e:2x2
jax: 0.10.0
libtpu: 0.0.40
codegen_flags: <defaults>
</compile_context>

<pallas_src>
import jax
import jax.numpy as jnp
from jax.experimental import pallas as pl
from jax.experimental.pallas import tpu as pltpu


# ---------------------------------------------------------------------------
# Kernel
# ---------------------------------------------------------------------------
def _make_fused_kernel(num_layers, H, kh_list):
    """kernel(x_ref, (w_ref, b_ref) * num_layers, o_ref).

    x_ref : (M, W*Cin0)          bf16 activation rows (M = images_per_block * H)
    w_ref : (W*Cin, KH*W*Cout)   bf16 block-Toeplitz weight, BN scale folded, taps concat on lanes
    b_ref : (1, W*Cout)          f32 BN bias row
    o_ref : (M, W*Cout_last)     f32 output rows
    """

    def kernel(x_ref, *rest):
        o_ref = rest[-1]
        y = x_ref[...]                                   # bf16, (M, W*Cin0)
        M = y.shape[0]

        # Hoisted out of the layer loop: row-within-image index and boundary masks,
        # cached per (vertical offset, lane width).
        row_cache = {}
        mask_cache = {}

        def rows_mod_h(ncol):
            if ncol not in row_cache:
                row_cache[ncol] = (
                    jax.lax.broadcasted_iota(jnp.int32, (M, ncol), 0) % H
                )
            return row_cache[ncol]

        def mask_for(d, ncol):
            key = (d, ncol)
            if key not in mask_cache:
                r = rows_mod_h(ncol)
                mask_cache[key] = (r >= -d) & (r < H - d)
            return mask_cache[key]

        for li in range(num_layers):
            w_ref = rest[2 * li]
            b_ref = rest[2 * li + 1]
            KH = kh_list[li]
            ncol = w_ref.shape[1] // KH                  # = W*Cout of this layer

            # ONE MXU matmul per layer; all KH vertical taps come out side by side on lanes.
            z = jnp.dot(y, w_ref[...], preferred_element_type=jnp.float32)  # (M, KH*ncol)

            c = KH // 2
            # Center tap needs no roll/mask; fold the BN bias into the accumulator init.
            acc = z[:, c * ncol:(c + 1) * ncol] + b_ref[...]
            for kh in range(KH):                         # static unroll over remaining taps
                if kh == c:
                    continue
                d = kh - c                               # vertical offset of this tap
                zt = pltpu.roll(z[:, kh * ncol:(kh + 1) * ncol], shift=(-d) % M, axis=0)
                # row % H mask: zero rows whose source row crossed an image boundary.
                acc = acc + jnp.where(mask_for(d, ncol), zt, 0.0)

            y = jnp.maximum(acc, 0.0)                    # BN bias already added; ReLU in f32
            if li + 1 < num_layers:
                y = y.astype(jnp.bfloat16)               # bf16 operands for the next MXU matmul

        o_ref[...] = y.astype(o_ref.dtype)

    return kernel


# ---------------------------------------------------------------------------
# Weight preparation (run ONCE, outside the jitted forward)
# ---------------------------------------------------------------------------
def _build_toeplitz_weight(w_hwio, scale, W, dtype):
    """(KH, KW, Cin, Cout) conv weight (BN scale folded) ->
    (W*Cin, KH*W*Cout): the KH per-tap block-Toeplitz matrices concatenated along the
    output/lane axis, so one matmul computes every vertical tap.  Horizontal zero-padding is
    baked into the zero blocks."""
    KH, KW, Cin, Cout = w_hwio.shape
    assert KH == KW and KH % 2 == 1, "only odd square kernels (pad=k//2) are supported"
    we = w_hwio * scale[None, None, None, :]
    wi = jnp.arange(W)[:, None]                 # input column index
    wo = jnp.arange(W)[None, :]                 # output column index
    kw = wi - wo + KW // 2                      # which horizontal tap links them
    valid = (kw >= 0) & (kw < KW)
    g = we[:, jnp.clip(kw, 0, KW - 1), :, :]    # (KH, W, W, Cin, Cout)
    g = g * valid[None, :, :, None, None].astype(we.dtype)
    g = jnp.transpose(g, (1, 3, 0, 2, 4))       # (W_in, Cin, KH, W_out, Cout)
    return g.reshape(W * Cin, KH * W * Cout).astype(dtype)


def prepare_multiconv_params(params, W, eps=1e-5, compute_dtype=jnp.bfloat16):
    """Fold BN into the conv weights and build the lane-concatenated Toeplitz matrices +
    bias rows once at init time (not per forward call)."""
    prepared = []
    for p in params:
        KH, KW, _, cout = p["w"].shape
        assert KH == KW and KH % 2 == 1, "unsupported kernel size for this Pallas kernel"
        scale = p["gamma"] * jax.lax.rsqrt(p["rvar"] + eps)
        bias = p["beta"] - p["rmean"] * scale
        big_w = _build_toeplitz_weight(p["w"], scale, W, compute_dtype)   # (W*Cin, KH*W*Cout)
        bias_row = jnp.tile(bias, W).reshape(1, W * cout).astype(jnp.float32)
        prepared.append(dict(w=big_w, b=bias_row, kh=int(KH), cout=int(cout)))
    return prepared


# ---------------------------------------------------------------------------
# Forward (NHWC end-to-end; no layout transposes inside)
# ---------------------------------------------------------------------------
def _default_row_blocks(N):
    """v7x has 2 TensorCores/chip: shard the batch-row grid axis across them.
    v5e/v6e have 1 TC: a single grid step avoids pure per-step overhead."""
    try:
        kind = jax.devices()[0].device_kind.lower()
    except Exception:
        kind = ""
    if "v7" in kind and N >= 2 and N % 2 == 0:
        return 2
    return 1


def make_multiconv_fn(in_ch, H, W, kh_list, couts, row_blocks,
                      out_dtype=jnp.float32, compute_dtype=jnp.bfloat16):
    num_layers = len(kh_list)
    cout_last = couts[-1]
    kernel = _make_fused_kernel(num_layers, H, kh_list)

    def forward(x_nhwc, *wb_flat):
        N = x_nhwc.shape[0]
        assert N % row_blocks == 0
        rows_per_block = (N // row_blocks) * H
        # NHWC -> (N*H, W*C) is a pure reshape (no transpose): batch folded into the matmul M.
        x_rows = x_nhwc.reshape(N * H, W * in_ch).astype(compute_dtype)

        args = [x_rows]
        in_specs = [pl.BlockSpec((rows_per_block, W * in_ch), lambda b: (b, 0))]
        for li in range(num_layers):
            w = wb_flat[2 * li]
            b = wb_flat[2 * li + 1]
            args += [w, b]
            in_specs += [
                pl.BlockSpec(w.shape, lambda b_: (0, 0)),   # grid-invariant, VMEM resident
                pl.BlockSpec(b.shape, lambda b_: (0, 0)),
            ]

        out = pl.pallas_call(
            kernel,
            out_shape=jax.ShapeDtypeStruct((N * H, W * cout_last), out_dtype),
            grid=(row_blocks,),
            in_specs=in_specs,
            out_specs=pl.BlockSpec((rows_per_block, W * cout_last), lambda b: (b, 0)),
            compiler_params=pltpu.CompilerParams(dimension_semantics=("parallel",)),
        )(*args)
        return out.reshape(N, H, W, cout_last)

    return forward


# ---------------------------------------------------------------------------
# Init matching MultiConv.__init__ + pure-JAX reference
# ---------------------------------------------------------------------------
def make_multiconv_params(key, in_ch, channels, kernel_sizes):
    """Deterministic init matching MultiConv.__init__ (kaiming_normal_ conv, BN w=1, b=0)."""
    params = []
    prev = in_ch
    for c, k in zip(channels, kernel_sizes):
        key, sub = jax.random.split(key)
        fan_in = prev * k * k
        std = (2.0 / fan_in) ** 0.5            # kaiming_normal_, fan_in, relu gain
        w = jax.random.normal(sub, (k, k, prev, c), jnp.float32) * std   # HWIO
        params.append(dict(
            w=w,
            gamma=jnp.ones((c,), jnp.float32),
            beta=jnp.zeros((c,), jnp.float32),
            rmean=jnp.zeros((c,), jnp.float32),
            rvar=jnp.ones((c,), jnp.float32),
        ))
        prev = c
    return params


def multiconv_reference_nhwc(x_nhwc, params, eps=1e-5):
    """Pure-JAX f32 reference (lax conv + BN(eval) + ReLU per layer), NHWC layout."""
    x = x_nhwc
    for p in params:
        k = p["w"].shape[0]
        pad = k // 2
        y = jax.lax.conv_general_dilated(
            x, p["w"], window_strides=(1, 1), padding=[(pad, pad), (pad, pad)],
            dimension_numbers=("NHWC", "HWIO", "NHWC"))
        scale = p["gamma"] / jnp.sqrt(p["rvar"] + eps)
        x = jnp.maximum(y * scale + (p["beta"] - p["rmean"] * scale), 0.0)
    return x


if __name__ == "__main__":
    key = jax.random.PRNGKey(0)
    k_x, k_p = jax.random.split(key)

    # MultiConv(in_ch=4, channels=[8, 8]) with default kernel_sizes/strides/dilations/paddings.
    in_ch, channels = 4, [8, 8]
    kernel_sizes = [3, 3]
    N, H, W = 2, 16, 16

    x_nchw = jax.random.normal(k_x, (N, in_ch, H, W), jnp.float32)   # PyTorch-style NCHW input
    params = make_multiconv_params(k_p, in_ch, channels, kernel_sizes)

    # Keep the model path NHWC end-to-end; convert the NCHW test input once here.
    x_nhwc = jnp.transpose(x_nchw, (0, 2, 3, 1))

    # Precompute BN-folded Toeplitz weights / bias rows ONCE (outside the jitted forward).
    prepared = prepare_multiconv_params(params, W)
    wb_flat = []
    for p in prepared:
        wb_flat += [p["w"], p["b"]]

    row_blocks = _default_row_blocks(N)
    fwd = jax.jit(make_multiconv_fn(
        in_ch, H, W,
        kh_list=[p["kh"] for p in prepared],
        couts=[p["cout"] for p in prepared],
        row_blocks=row_blocks,
    ))
    out = jax.block_until_ready(fwd(x_nhwc, *wb_flat))

    ref = jax.block_until_ready(multiconv_reference_nhwc(x_nhwc, params))
    assert out.shape == (N, H, W, channels[-1]), out.shape
    max_err = float(jnp.max(jnp.abs(out - ref)))
    # bf16 MXU operands vs. f32 reference -> tolerance loosened (per perf review).
    assert jnp.allclose(out, ref, atol=8e-2, rtol=8e-2), max_err

    print("KERNEL_OK")
</pallas_src>

<mosaic_0001>
module attributes {stable_mosaic.version = 11 : i64} {
  func.func @kernel(%arg0: i32, %arg1: memref<32x64xbf16, #tpu.memory_space<vmem>>, %arg2: memref<64x384xbf16, #tpu.memory_space<vmem>>, %arg3: memref<1x128xf32, #tpu.memory_space<vmem>>, %arg4: memref<128x384xbf16, #tpu.memory_space<vmem>>, %arg5: memref<1x128xf32, #tpu.memory_space<vmem>>, %arg6: memref<32x128xf32, #tpu.memory_space<vmem>>) attributes {dimension_semantics = [#tpu.dimension_semantics<parallel>], iteration_bounds = array<i64: 1>, scalar_prefetch = 0 : i64, scratch_operands = 0 : i64, tpu.core_type = #tpu.core_type<tc>, window_params = [{transform_indices = @transform_0, window_bounds = array<i64: 32, 64>}, {pipeline_mode = #tpu.pipeline_mode<synchronous>, transform_indices = @transform_1, window_bounds = array<i64: 64, 384>}, {pipeline_mode = #tpu.pipeline_mode<synchronous>, transform_indices = @transform_2, window_bounds = array<i64: 1, 128>}, {pipeline_mode = #tpu.pipeline_mode<synchronous>, transform_indices = @transform_3, window_bounds = array<i64: 128, 384>}, {pipeline_mode = #tpu.pipeline_mode<synchronous>, transform_indices = @transform_4, window_bounds = array<i64: 1, 128>}, {transform_indices = @transform_5, window_bounds = array<i64: 32, 128>}]} {
    %c0 = arith.constant 0 : index
    %c0_0 = arith.constant 0 : index
    %0 = vector.load %arg1[%c0, %c0_0] : memref<32x64xbf16, #tpu.memory_space<vmem>>, vector<32x64xbf16>
    %c0_1 = arith.constant 0 : index
    %c0_2 = arith.constant 0 : index
    %1 = vector.load %arg2[%c0_1, %c0_2] : memref<64x384xbf16, #tpu.memory_space<vmem>>, vector<64x384xbf16>
    %cst = arith.constant dense<0.000000e+00> : vector<32x384xf32>
    %2 = tpu.matmul %0, %1, %cst {dimension_numbers = #tpu.dot_dimension_numbers<[1], [0], [0], [1], [0, 0, 1, 1], [], []>} : vector<32x64xbf16>, vector<64x384xbf16>, vector<32x384xf32> -> vector<32x384xf32>
    %3 = vector.extract_strided_slice %2 {offsets = [0, 128], sizes = [32, 128], strides = [1, 1]} : vector<32x384xf32> to vector<32x128xf32>
    %c0_3 = arith.constant 0 : index
    %c0_4 = arith.constant 0 : index
    %4 = vector.load %arg3[%c0_3, %c0_4] : memref<1x128xf32, #tpu.memory_space<vmem>>, vector<1x128xf32>
    %5 = vector.broadcast %4 : vector<1x128xf32> to vector<32x128xf32>
    %6 = arith.addf %3, %5 : vector<32x128xf32>
    %7 = vector.extract_strided_slice %2 {offsets = [0, 0], sizes = [32, 128], strides = [1, 1]} : vector<32x384xf32> to vector<32x128xf32>
    %c1_i32 = arith.constant 1 : i32
    %8 = tpu.dynamic_rotate %7 by %c1_i32 dim 0 : vector<32x128xf32>, i32 -> vector<32x128xf32>
    %9 = tpu.iota {dimensions = array<i32: 0>} : vector<32x128xi32>
    %c16_i32 = arith.constant 16 : i32
    %c0_i32 = arith.constant 0 : i32
    %10 = arith.cmpi eq, %c16_i32, %c0_i32 : i32
    %c1_i32_5 = arith.constant 1 : i32
    %11 = arith.select %10, %c1_i32_5, %c16_i32 : i32
    %12 = vector.broadcast %11 : i32 to vector<32x128xi32>
    %13 = arith.remsi %9, %12 : vector<32x128xi32>
    %c0_i32_6 = arith.constant 0 : i32
    %14 = vector.broadcast %c0_i32_6 : i32 to vector<32x128xi32>
    %15 = arith.cmpi ne, %13, %14 : vector<32x128xi32>
    %c0_i32_7 = arith.constant 0 : i32
    %16 = vector.broadcast %c0_i32_7 : i32 to vector<32x128xi32>
    %17 = arith.cmpi slt, %13, %16 : vector<32x128xi32>
    %c0_i32_8 = arith.constant 0 : i32
    %18 = arith.cmpi slt, %11, %c0_i32_8 : i32
    %19 = vector.broadcast %18 : i1 to vector<32x128xi1>
    %20 = vector.broadcast %19 : vector<32x128xi1> to vector<32x128xi1>
    %21 = arith.xori %17, %20 : vector<32x128xi1>
    %22 = arith.andi %21, %15 : vector<32x128xi1>
    %23 = vector.broadcast %11 : i32 to vector<32x128xi32>
    %24 = arith.addi %13, %23 : vector<32x128xi32>
    %25 = arith.select %22, %24, %13 : vector<32x128xi1>, vector<32x128xi32>
    %c1_i32_9 = arith.constant 1 : i32
    %26 = vector.broadcast %c1_i32_9 : i32 to vector<32x128xi32>
    %27 = arith.cmpi sge, %25, %26 : vector<32x128xi32>
    %c17_i32 = arith.constant 17 : i32
    %28 = vector.broadcast %c17_i32 : i32 to vector<32x128xi32>
    %29 = arith.cmpi slt, %25, %28 : vector<32x128xi32>
    %30 = arith.andi %27, %29 : vector<32x128xi1>
    %cst_10 = arith.constant 0.000000e+00 : f32
    %31 = vector.broadcast %cst_10 : f32 to vector<32x128xf32>
    %32 = arith.select %30, %8, %31 : vector<32x128xi1>, vector<32x128xf32>
    %33 = arith.addf %6, %32 : vector<32x128xf32>
    %34 = vector.extract_strided_slice %2 {offsets = [0, 256], sizes = [32, 128], strides = [1, 1]} : vector<32x384xf32> to vector<32x128xf32>
    %c31_i32 = arith.constant 31 : i32
    %35 = tpu.dynamic_rotate %34 by %c31_i32 dim 0 : vector<32x128xf32>, i32 -> vector<32x128xf32>
    %c-1_i32 = arith.constant -1 : i32
    %36 = vector.broadcast %c-1_i32 : i32 to vector<32x128xi32>
    %37 = arith.cmpi sge, %25, %36 : vector<32x128xi32>
    %c15_i32 = arith.constant 15 : i32
    %38 = vector.broadcast %c15_i32 : i32 to vector<32x128xi32>
    %39 = arith.cmpi slt, %25, %38 : vector<32x128xi32>
    %40 = arith.andi %37, %39 : vector<32x128xi1>
    %cst_11 = arith.constant 0.000000e+00 : f32
    %41 = vector.broadcast %cst_11 : f32 to vector<32x128xf32>
    %42 = arith.select %40, %35, %41 : vector<32x128xi1>, vector<32x128xf32>
    %43 = arith.addf %33, %42 : vector<32x128xf32>
    %cst_12 = arith.constant 0.000000e+00 : f32
    %44 = vector.broadcast %cst_12 : f32 to vector<32x128xf32>
    %45 = arith.maximumf %43, %44 : vector<32x128xf32>
    %46 = arith.truncf %45 : vector<32x128xf32> to vector<32x128xbf16>
    %c0_13 = arith.constant 0 : index
    %c0_14 = arith.constant 0 : index
    %47 = vector.load %arg4[%c0_13, %c0_14] : memref<128x384xbf16, #tpu.memory_space<vmem>>, vector<128x384xbf16>
    %cst_15 = arith.constant dense<0.000000e+00> : vector<32x384xf32>
    %48 = tpu.matmul %46, %47, %cst_15 {dimension_numbers = #tpu.dot_dimension_numbers<[1], [0], [0], [1], [0, 0, 1, 1], [], []>} : vector<32x128xbf16>, vector<128x384xbf16>, vector<32x384xf32> -> vector<32x384xf32>
    %49 = vector.extract_strided_slice %48 {offsets = [0, 128], sizes = [32, 128], strides = [1, 1]} : vector<32x384xf32> to vector<32x128xf32>
    %c0_16 = arith.constant 0 : index
    %c0_17 = arith.constant 0 : index
    %50 = vector.load %arg5[%c0_16, %c0_17] : memref<1x128xf32, #tpu.memory_space<vmem>>, vector<1x128xf32>
    %51 = vector.broadcast %50 : vector<1x128xf32> to vector<32x128xf32>
    %52 = arith.addf %49, %51 : vector<32x128xf32>
    %53 = vector.extract_strided_slice %48 {offsets = [0, 0], sizes = [32, 128], strides = [1, 1]} : vector<32x384xf32> to vector<32x128xf32>
    %c1_i32_18 = arith.constant 1 : i32
    %54 = tpu.dynamic_rotate %53 by %c1_i32_18 dim 0 : vector<32x128xf32>, i32 -> vector<32x128xf32>
    %cst_19 = arith.constant 0.000000e+00 : f32
    %55 = vector.broadcast %cst_19 : f32 to vector<32x128xf32>
    %56 = arith.select %30, %54, %55 : vector<32x128xi1>, vector<32x128xf32>
    %57 = arith.addf %52, %56 : vector<32x128xf32>
    %58 = vector.extract_strided_slice %48 {offsets = [0, 256], sizes = [32, 128], strides = [1, 1]} : vector<32x384xf32> to vector<32x128xf32>
    %c31_i32_20 = arith.constant 31 : i32
    %59 = tpu.dynamic_rotate %58 by %c31_i32_20 dim 0 : vector<32x128xf32>, i32 -> vector<32x128xf32>
    %cst_21 = arith.constant 0.000000e+00 : f32
    %60 = vector.broadcast %cst_21 : f32 to vector<32x128xf32>
    %61 = arith.select %40, %59, %60 : vector<32x128xi1>, vector<32x128xf32>
    %62 = arith.addf %57, %61 : vector<32x128xf32>
    %cst_22 = arith.constant 0.000000e+00 : f32
    %63 = vector.broadcast %cst_22 : f32 to vector<32x128xf32>
    %64 = arith.maximumf %62, %63 : vector<32x128xf32>
    %c0_23 = arith.constant 0 : index
    %c0_24 = arith.constant 0 : index
    %65 = vector.load %arg6[%c0_23, %c0_24] : memref<32x128xf32, #tpu.memory_space<vmem>>, vector<32x128xf32>
    tpu.vector_store %arg6[%c0_23, %c0_24], %64 {strides = array<i32>} : memref<32x128xf32, #tpu.memory_space<vmem>>, vector<32x128xf32>,
    return
  }
  func.func @transform_0(%arg0: i32) -> (i32, i32) {
    %c0_i32 = arith.constant 0 : i32
    %c0_i32_0 = arith.constant 0 : i32
    return %arg0, %c0_i32 : i32, i32
  }
  func.func @transform_1(%arg0: i32) -> (i32, i32) {
    %c0_i32 = arith.constant 0 : i32
    %c0_i32_0 = arith.constant 0 : i32
    %c0_i32_1 = arith.constant 0 : i32
    return %c0_i32, %c0_i32_0 : i32, i32
  }
  func.func @transform_2(%arg0: i32) -> (i32, i32) {
    %c0_i32 = arith.constant 0 : i32
    %c0_i32_0 = arith.constant 0 : i32
    %c0_i32_1 = arith.constant 0 : i32
    return %c0_i32, %c0_i32_0 : i32, i32
  }
  func.func @transform_3(%arg0: i32) -> (i32, i32) {
    %c0_i32 = arith.constant 0 : i32
    %c0_i32_0 = arith.constant 0 : i32
    %c0_i32_1 = arith.constant 0 : i32
    return %c0_i32, %c0_i32_0 : i32, i32
  }
  func.func @transform_4(%arg0: i32) -> (i32, i32) {
    %c0_i32 = arith.constant 0 : i32
    %c0_i32_0 = arith.constant 0 : i32
    %c0_i32_1 = arith.constant 0 : i32
    return %c0_i32, %c0_i32_0 : i32, i32
  }
  func.func @transform_5(%arg0: i32) -> (i32, i32) {
    %c0_i32 = arith.constant 0 : i32
    %c0_i32_0 = arith.constant 0 : i32
    return %arg0, %c0_i32 : i32, i32
  }
}

</mosaic_0001>

<bundles_post_ra>
// kernel: forward.1
= control target key start
LH: loop header
LB: loop body
LE: loop exit
PB: predicated region body
PF: predicated region fallthrough
CT: control target
= control target key end

     0   :  { %vm115_vm0 = vcmask 523264   ;;  %s1121_s1 = inlined_call_operand.vmem [shape: bf16[64,384], index: 1, kind: input, shape index: {}]   ;;  %s1122_s0 = inlined_call_operand.vmem [shape: bf16[32,64], index: 0, kind: input, shape index: {}]   ;;  %s1123_s2 = inlined_call_operand.vmem [shape: f32[1,128], index: 2, kind: input, shape index: {}]   ;;  %s1124_s4 = inlined_call_operand.vmem [shape: f32[1,128], index: 4, kind: input, shape index: {}]   ;;  %s1125_s3 = inlined_call_operand.vmem [shape: bf16[128,384], index: 3, kind: input, shape index: {}]   ;;  %s1126_s5 = inlined_call_operand.vmem [shape: f32[32,128], index: 5, kind: output, shape index: {}]  }
   0x1   :  { %v619_v0 = vld [vmem:[%s1121_s1 + $0x48] sm:$0xf]  ;;  %v743_v1 = vld [vmem:[%s1121_s1 + $0x50] sm:$0xf0]  ;;  %v627_v2 = vld [vmem:[%s1121_s1 + $0x50] sm:$0xf] }
   0x2   :  { %v620_v3 = vor.u32 %v743_v1, %v619_v0  ;;  %v744_v4 = vld [vmem:[%s1121_s1 + $0x58] sm:$0xf0]  ;;  %v742_v5 = vld [vmem:[%s1121_s1 + $0x4c] sm:$0xf]  ;;  %v621_v6 = vld [vmem:[%s1121_s1 + $0x54] sm:$0xf0] }
   0x3   :  { %v628_v7 = vor.u32 %v744_v4, %v627_v2  ;;  %v624_v8 = vor.u32 %v742_v5, %v621_v6  ;;  %v607_v9 = vld [vmem:[%s1121_s1 + $0x30] sm:$0xf]  ;;  %v740_v10 = vld [vmem:[%s1121_s1 + $0x38] sm:$0xf0]  ;;  %v615_v11 = vld [vmem:[%s1121_s1 + $0x38] sm:$0xf] }
   0x4   :  { %126 = vmatpush.bf16.msra.mxu0 %v620_v3  ;;  %v608_v12 = vor.u32 %v740_v10, %v607_v9  ;;  %v741_v13 = vld [vmem:[%s1121_s1 + $0x40] sm:$0xf0]  ;;  %v739_v14 = vld [vmem:[%s1121_s1 + $0x34] sm:$0xf]  ;;  %v609_v15 = vld [vmem:[%s1121_s1 + $0x3c] sm:$0xf0] }
   0x5   :  { %164 = vmatpush.bf16.msra.mxu2 %v628_v7  ;;  %145 = vmatpush.bf16.msra.mxu1 %v624_v8  ;;  %v616_v16 = vor.u32 %v741_v13, %v615_v11  ;;  %v612_v17 = vor.u32 %v739_v14, %v609_v15  ;;  %v595_v18 = vld [vmem:[%s1121_s1 + $0x18] sm:$0xf]  ;;  %v737_v19 = vld [vmem:[%s1121_s1 + $0x20] sm:$0xf0]  ;;  %v603_v20 = vld [vmem:[%s1121_s1 + $0x20] sm:$0xf] }
   0x6   :  { %v738_v21 = vld [vmem:[%s1121_s1 + $0x28] sm:$0xf0]  ;;  %v736_v22 = vld [vmem:[%s1121_s1 + $0x1c] sm:$0xf]  ;;  %v597_v23 = vld [vmem:[%s1121_s1 + $0x24] sm:$0xf0]  ;;  %v596_v24 = vor.u32 %v737_v19, %v595_v18 }
   0x7   :  { %v604_v25 = vor.u32 %v738_v21, %v603_v20  ;;  %v600_v26 = vor.u32 %v736_v22, %v597_v23  ;;  %v583_v27 = vld [vmem:[%s1121_s1] sm:$0xf]  ;;  %v734_v28 = vld [vmem:[%s1121_s1 + $0x8] sm:$0xf0]  ;;  %v591_v29 = vld [vmem:[%s1121_s1 + $0x8] sm:$0xf] }
   0x8   :  { %127 = vmatpush.bf16.msra.mxu0 %v608_v12  ;;  %v735_v30 = vld [vmem:[%s1121_s1 + $0x10] sm:$0xf0]  ;;  %v733_v31 = vld [vmem:[%s1121_s1 + $0x4] sm:$0xf]  ;;  %v585_v32 = vld [vmem:[%s1121_s1 + $0xc] sm:$0xf0]  ;;  %v584_v33 = vor.u32 %v734_v28, %v583_v27 }
   0x9   :  { %165 = vmatpush.bf16.msra.mxu2 %v616_v16  ;;  %146 = vmatpush.bf16.msra.mxu1 %v612_v17  ;;  %v592_v34 = vor.u32 %v735_v30, %v591_v29  ;;  %v588_v35 = vor.u32 %v733_v31, %v585_v32  ;;  %v731_v36 = vld [vmem:[%s1122_s0] sm:$0xff]  ;;  %v732_v37 = vld [vmem:[%s1122_s0 + $0x8] sm:$0xff]  ;;  %v767_v39 = vld [vmem:[%s1125_s3 + $0xb0] sm:$0xf0] }
   0xa   :  { %v721_v38 = vld [vmem:[%s1125_s3 + $0xa8] sm:$0xf]  ;;  %v766_v40 = vld [vmem:[%s1125_s3 + $0xac] sm:$0xf]  ;;  %v723_v42 = vld [vmem:[%s1125_s3 + $0xb4] sm:$0xf0] }
   0xb   :  { %v722_v41 = vor.u32 %v767_v39, %v721_v38  ;;  %v729_v43 = vld [vmem:[%s1125_s3 + $0xb0] sm:$0xf]  ;;  %v768_v44 = vld [vmem:[%s1125_s3 + $0xb8] sm:$0xf0]  ;;  %v726_v45 = vor.u32 %v766_v40, %v723_v42  ;;  %v763_v49 = vld [vmem:[%s1125_s3 + $0x94] sm:$0xf] }
   0xc   :  { %128 = vmatpush.bf16.msra.mxu0 %v596_v24  ;;  %v730_v46 = vor.u32 %v768_v44, %v729_v43  ;;  %v709_v47 = vld [vmem:[%s1125_s3 + $0x90] sm:$0xf]  ;;  %v764_v48 = vld [vmem:[%s1125_s3 + $0x98] sm:$0xf0]  ;;  %v711_v51 = vld [vmem:[%s1125_s3 + $0x9c] sm:$0xf0] }
   0xd   :  { %166 = vmatpush.bf16.msra.mxu2 %v604_v25  ;;  %147 = vmatpush.bf16.msra.mxu1 %v600_v26  ;;  %v710_v50 = vor.u32 %v764_v48, %v709_v47  ;;  %v717_v52 = vld [vmem:[%s1125_s3 + $0x98] sm:$0xf]  ;;  %v714_v53 = vor.u32 %v763_v49, %v711_v51  ;;  %v765_v54 = vld [vmem:[%s1125_s3 + $0xa0] sm:$0xf0]  ;;  %v760_v58 = vld [vmem:[%s1125_s3 + $0x7c] sm:$0xf]  ;;  %v191_v51 = vlaneseq }
   0xe   :  { %464 = vmatpush.bf16.msra.mxu3 %v722_v41  ;;  %v718_v55 = vor.u32 %v765_v54, %v717_v52  ;;  %v697_v56 = vld [vmem:[%s1125_s3 + $0x78] sm:$0xf]  ;;  %v761_v57 = vld [vmem:[%s1125_s3 + $0x80] sm:$0xf0]  ;;  %v699_v60 = vld [vmem:[%s1125_s3 + $0x84] sm:$0xf0] }
   0xf   :  { %v698_v59 = vor.u32 %v761_v57, %v697_v56  ;;  %v705_v61 = vld [vmem:[%s1125_s3 + $0x80] sm:$0xf]  ;;  %v762_v62 = vld [vmem:[%s1125_s3 + $0x88] sm:$0xf0]  ;;  %v702_v63 = vor.u32 %v760_v58, %v699_v60  ;;  %v757_v4 = vld [vmem:[%s1125_s3 + $0x64] sm:$0xf] }
  0x10   :  { %129 = vmatpush.bf16.msra.mxu0 %v584_v33  ;;  %v706_v0 = vor.u32 %v762_v62, %v705_v61  ;;  %v685_v1 = vld [vmem:[%s1125_s3 + $0x60] sm:$0xf]  ;;  %v758_v2 = vld [vmem:[%s1125_s3 + $0x68] sm:$0xf0]  ;;  %v687_v5 = vld [vmem:[%s1125_s3 + $0x6c] sm:$0xf0] }
  0x11   :  { %167 = vmatpush.bf16.msra.mxu2 %v592_v34  ;;  %148 = vmatpush.bf16.msra.mxu1 %v588_v35  ;;  %v686_v3 = vor.u32 %v758_v2, %v685_v1  ;;  %v693_v6 = vld [vmem:[%s1125_s3 + $0x68] sm:$0xf]  ;;  %v690_v7 = vor.u32 %v757_v4, %v687_v5  ;;  %v759_v8 = vld [vmem:[%s1125_s3 + $0x70] sm:$0xf0]  ;;  %v754_v13 = vld [vmem:[%s1125_s3 + $0x4c] sm:$0xf] }
  0x12   :  { %465 = vmatpush.bf16.msra.mxu3 %v710_v50  ;;  %v694_v9 = vor.u32 %v759_v8, %v693_v6  ;;  %v673_v10 = vld [vmem:[%s1125_s3 + $0x48] sm:$0xf]  ;;  %v755_v11 = vld [vmem:[%s1125_s3 + $0x50] sm:$0xf0]  ;;  %v675_v14 = vld [vmem:[%s1125_s3 + $0x54] sm:$0xf0] }
  0x13   :  { %629 = vmatmul.msk.bf16.vlgmr.msra.gmra.mxu0 %vm115_vm0, %v731_v36  ;;  %v674_v12 = vor.u32 %v755_v11, %v673_v10  ;;  %v681_v15 = vld [vmem:[%s1125_s3 + $0x50] sm:$0xf]  ;;  %v678_v16 = vor.u32 %v754_v13, %v675_v14  ;;  %v756_v17 = vld [vmem:[%s1125_s3 + $0x58] sm:$0xf0]  ;;  %v751_v22 = vld [vmem:[%s1125_s3 + $0x34] sm:$0xf] }
  0x14   :  { %633 = vmatmul.msk.bf16.vlgmr.msra.gmra.mxu2 %vm115_vm0, %v731_v36  ;;  %631 = vmatmul.msk.bf16.vlgmr.msra.gmra.mxu1 %vm115_vm0, %v731_v36  ;;  %v682_v18 = vor.u32 %v756_v17, %v681_v15  ;;  %v661_v19 = vld [vmem:[%s1125_s3 + $0x30] sm:$0xf]  ;;  %v752_v20 = vld [vmem:[%s1125_s3 + $0x38] sm:$0xf0]  ;;  %v663_v23 = vld [vmem:[%s1125_s3 + $0x3c] sm:$0xf0] }
  0x15   :  { %483 = vmatpush.bf16.msrb.mxu0 %v726_v45  ;;  %502 = vmatpush.bf16.msrb.mxu1 %v730_v46  ;;  %v662_v21 = vor.u32 %v752_v20, %v661_v19  ;;  %v669_v24 = vld [vmem:[%s1125_s3 + $0x38] sm:$0xf]  ;;  %v666_v25 = vor.u32 %v751_v22, %v663_v23  ;;  %v753_v26 = vld [vmem:[%s1125_s3 + $0x40] sm:$0xf0]  ;;  %v748_v31 = vld [vmem:[%s1125_s3 + $0x1c] sm:$0xf] }
  0x16   :  { %769 = vmatpush.bf16.msrb.mxu2 %v726_v45  ;;  %466 = vmatpush.bf16.msra.mxu3 %v698_v59  ;;  %v670_v27 = vor.u32 %v753_v26, %v669_v24  ;;  %v649_v28 = vld [vmem:[%s1125_s3 + $0x18] sm:$0xf]  ;;  %v749_v29 = vld [vmem:[%s1125_s3 + $0x20] sm:$0xf0]  ;;  %v651_v32 = vld [vmem:[%s1125_s3 + $0x24] sm:$0xf0] }
  0x17   :  { %v650_v30 = vor.u32 %v749_v29, %v649_v28  ;;  %v657_v33 = vld [vmem:[%s1125_s3 + $0x20] sm:$0xf]  ;;  %v654_v34 = vor.u32 %v748_v31, %v651_v32  ;;  %v750_v35 = vld [vmem:[%s1125_s3 + $0x28] sm:$0xf0]  ;;  %v745_v42 = vld [vmem:[%s1125_s3 + $0x4] sm:$0xf] }
  0x18   :  { %v658_v36 = vor.u32 %v750_v35, %v657_v33  ;;  %v637_v38 = vld [vmem:[%s1125_s3] sm:$0xf]  ;;  %v746_v39 = vld [vmem:[%s1125_s3 + $0x8] sm:$0xf0]  ;;  %v639_v43 = vld [vmem:[%s1125_s3 + $0xc] sm:$0xf0] }
  0x19   :  { %484 = vmatpush.bf16.msrb.mxu0 %v714_v53  ;;  %503 = vmatpush.bf16.msrb.mxu1 %v718_v55  ;;  %v638_v41 = vor.u32 %v746_v39, %v637_v38  ;;  %v642_v44 = vor.u32 %v745_v42, %v639_v43  ;;  %v645_v45 = vld [vmem:[%s1125_s3 + $0x8] sm:$0xf]  ;;  %v747_v46 = vld [vmem:[%s1125_s3 + $0x10] sm:$0xf0]  ;;  %v1031_v52 = vshrl.u32 %v191_v51, 7 }
  0x1a   :  { %770 = vmatpush.bf16.msrb.mxu2 %v714_v53  ;;  %467 = vmatpush.bf16.msra.mxu3 %v686_v3  ;;  %v646_v47 = vor.u32 %v747_v46, %v645_v45  ;;  %v777_v58 = vld [vmem:[%s1123_s2] ss:$0 sm:$0xff] }
  0x1b   :  { %v198_v54 = vadd.s32 8, %v1031_v52  ;;  %v199_v57 = vadd.s32 16, %v1031_v52  ;;  %vm193_vm1 = vcmp.lt.s32.totalorder %v1031_v52, 1  ;;  %v205_v61 = vand.u32 15, %v1031_v52  ;;  %v778_v51 = vld [vmem:[%s1124_s4] ss:$0 sm:$0xff] }
  0x1c   :  { %v200_v8 = vadd.s32 24, %v1031_v52  ;;  %vm273_vm3 = vcmp.lt.s32.totalorder %v1031_v52, 7 }
  0x1d   :  { %485 = vmatpush.bf16.msrb.mxu0 %v702_v63  ;;  %504 = vmatpush.bf16.msrb.mxu1 %v706_v0  ;;  %v212_v59 = vand.u32 15, %v198_v54  ;;  %vm1048_vm4 = vcmp.ge.s32.totalorder %v205_v61, 1 }
  0x1e   :  { %771 = vmatpush.bf16.msrb.mxu2 %v702_v63  ;;  %468 = vmatpush.bf16.msra.mxu3 %v674_v12  ;;  %v219_v63 = vand.u32 15, %v199_v57 }
  0x1f   :  { %vm1040_vm2 = vcmp.lt.s32.totalorder %v212_v59, 15 }
  0x20   :  { %vm1052_vm5 = vcmp.ge.s32.totalorder %v219_v63, 1 }
  0x21   :  { %486 = vmatpush.bf16.msrb.mxu0 %v690_v7  ;;  %505 = vmatpush.bf16.msrb.mxu1 %v694_v9 }
  0x22   :  { %772 = vmatpush.bf16.msrb.mxu2 %v690_v7  ;;  %469 = vmatpush.bf16.msra.mxu3 %v662_v21  ;;  %v226_v21 = vand.u32 15, %v200_v8 }
  0x23   :  { %630 = vmatmul.msk.bf16.gmra.mxu0 %vm115_vm0, %v732_v37 }
  0x24   :  { %634 = vmatmul.msk.bf16.gmra.mxu2 %vm115_vm0, %v732_v37  ;;  %632 = vmatmul.msk.bf16.gmra.mxu1 %vm115_vm0, %v732_v37  ;;  %vm1072_vm6 = vcmp.lt.s32.totalorder %v226_v21, 15 }
  0x25   :  { %487 = vmatpush.bf16.msrb.mxu0 %v678_v16  ;;  %506 = vmatpush.bf16.msrb.mxu1 %v682_v18 }
  0x26   :  { %773 = vmatpush.bf16.msrb.mxu2 %v678_v16  ;;  %470 = vmatpush.bf16.msra.mxu3 %v650_v30 }
  0x29   :  { %488 = vmatpush.bf16.msrb.mxu0 %v666_v25  ;;  %507 = vmatpush.bf16.msrb.mxu1 %v670_v27 }
  0x2a   :  { %774 = vmatpush.bf16.msrb.mxu2 %v666_v25  ;;  %471 = vmatpush.bf16.msra.mxu3 %v638_v41 }
  0x2d   :  { %489 = vmatpush.bf16.msrb.mxu0 %v654_v34  ;;  %508 = vmatpush.bf16.msrb.mxu1 %v658_v36 }
  0x2e   :  { %775 = vmatpush.bf16.msrb.mxu2 %v654_v34 }
  0x31   :  { %490 = vmatpush.bf16.msrb.mxu0 %v642_v44  ;;  %509 = vmatpush.bf16.msrb.mxu1 %v646_v47 }
  0x32   :  { %776 = vmatpush.bf16.msrb.mxu2 %v642_v44 }
  0x90   :  { %v131_v37 = vpop.f32.mrf.mxu0 }
  0x91   :  { %v150_v40 = vpop.f32.mrf.mxu1  ;;  %v187_v62 = vrot.slane %v131_v37, 7 }
  0x92   :  { %v183_v11 = vadd.f32 %v777_v58, %v150_v40 }
  0x97   :  { %v169_v48 = vpop.f32.mrf.mxu2 }
  0x98   :  { %v133_v49 = vpop.f32.mrf.mxu0  ;;  %v269_v19 = vrot.slane %v169_v48, 1 }
  0x99   :  { %v152_v50 = vpop.f32.mrf.mxu1  ;;  %v188_v60 = vrot.slane %v133_v49, 7 }
  0x9a   :  { %v184_v0 = vadd.f32 %v777_v58, %v152_v50 }
  0x9b   :  { %v196_v4 = vsel %vm193_vm1, %v187_v62, %v188_v60 }
  0x9c   :  { %v266_v14 = vadd.f32 %v196_v4, %v184_v0 }
  0x9f   :  { %v171_v53 = vpop.f32.mrf.mxu2 }
  0xa0   :  { %v136_v55 = vpop.f32.mrf.mxu0  ;;  %v270_v5 = vrot.slane %v171_v53, 1 }
  0xa1   :  { %v155_v56 = vpop.f32.mrf.mxu1  ;;  %v189_v1 = vrot.slane %v136_v55, 7 }
  0xa2   :  { %v185_v22 = vadd.f32 %v777_v58, %v155_v56  ;;  %v276_v25 = vsel %vm273_vm3, %v269_v19, %v270_v5 }
  0xa3   :  { %v195_v15 = vsel %vm193_vm1, %v188_v60, %v189_v1 }
  0xa4   :  { %v263_v26 = vsel %vm1052_vm5, %v195_v15, 0.0 }
  0xa5   :  { %v267_v33 = vadd.f32 %v263_v26, %v185_v22 }
  0xa7   :  { %v174_v2 = vpop.f32.mrf.mxu2 }
  0xa8   :  { %v271_v6 = vrot.slane %v174_v2, 1  ;;  %v138_v7 = vpop.f32.mrf.mxu0 }
  0xa9   :  { %v190_v9 = vrot.slane %v138_v7, 7  ;;  %v157_v18 = vpop.f32.mrf.mxu1 }
  0xaa   :  { %v275_v13 = vsel %vm273_vm3, %v270_v5, %v271_v6  ;;  %v186_v27 = vadd.f32 %v777_v58, %v157_v18 }
  0xab   :  { %v291_v16 = vsel %vm1040_vm2, %v275_v13, 0.0  ;;  %v197_v17 = vsel %vm193_vm1, %v190_v9, %v187_v62  ;;  %v194_v28 = vsel %vm193_vm1, %v189_v1, %v190_v9 }
  0xac   :  { %v261_v20 = vsel %vm1048_vm4, %v197_v17, 0.0  ;;  %v295_v24 = vadd.f32 %v291_v16, %v266_v14  ;;  %v268_v36 = vadd.f32 %v194_v28, %v186_v27 }
  0xad   :  { %v265_v23 = vadd.f32 %v261_v20, %v183_v11 }
  0xae   :  { %v299_v35 = vmax.f32 %v295_v24, 0.0 }
  0xaf   :  { %v176_v29 = vpop.f32.mrf.mxu2  ;;  %v294_v30 = vadd.f32 %v276_v25, %v265_v23 }
  0xb0   :  { %v272_v31 = vrot.slane %v176_v29, 1 }
  0xb1   :  { %v298_v34 = vmax.f32 %v294_v30, 0.0 }
  0xb2   :  { %v274_v37 = vsel %vm273_vm3, %v271_v6, %v272_v31  ;;  %v277_v38 = vsel %vm273_vm3, %v272_v31, %v269_v19 }
  0xb3   :  { %v293_v39 = vsel %vm1072_vm6, %v277_v38, 0.0  ;;  %v296_v40 = vadd.f32 %v274_v37, %v267_v33  ;;  %v302_v41 = vpack.c.bf16 %v299_v35, %v298_v34 }
  0xb4   :  { %v297_v42 = vadd.f32 %v293_v39, %v268_v36 }
  0xb5   :  { %472 = vmatmul.bf16.vlgmr.msra.gmra.mxu3 %v302_v41  ;;  %491 = vmatmul.bf16.vlgmr.msrb.gmra.mxu0 %v302_v41  ;;  %v300_v43 = vmax.f32 %v296_v40, 0.0 }
  0xb6   :  { %510 = vmatmul.bf16.vlgmr.msrb.gmra.mxu1 %v302_v41  ;;  %v301_v44 = vmax.f32 %v297_v42, 0.0 }
  0xb8   :  { %v303_v45 = vpack.c.bf16 %v301_v44, %v300_v43 }
  0xba   :  { %496 = vmatmul.bf16.vlgmr.msrb.gmra.mxu2 %v303_v45 }
  0xc5   :  { %477 = vmatmul.bf16.gmra.mxu3 %v303_v45 }
  0xc6   :  { %515 = vmatmul.bf16.gmra.mxu1 %v303_v45 }
 0x132   :  { %v492_v47 = vpop.f32.mrf.mxu0 }
 0x133   :  { %v511_v46 = vpop.f32.mrf.mxu1  ;;  %v525_v22 = vadd.f32 %v778_v51, %v492_v47 }
 0x134   :  { %v545_v16 = vrot.slane %v511_v46, 1 }
 0x138   :  { %v473_v48 = vpop.f32.mrf.mxu3 }
 0x139   :  { %v529_v54 = vrot.slane %v473_v48, 7 }
 0x13a   :  { %v494_v50 = vpop.f32.mrf.mxu0 }
 0x13b   :  { %v513_v49 = vpop.f32.mrf.mxu1  ;;  %v526_v56 = vadd.f32 %v778_v51, %v494_v50 }
 0x13c   :  { %v546_v59 = vrot.slane %v513_v49, 1 }
 0x13d   :  { %v497_v62 = vpop.f32.mrf.mxu2 }
 0x13e   :  { %v527_v6 = vadd.f32 %v778_v51, %v497_v62  ;;  %v551_v28 = vsel %vm273_vm3, %v545_v16, %v546_v59 }
 0x140   :  { %v475_v53 = vpop.f32.mrf.mxu3 }
 0x141   :  { %v530_v55 = vrot.slane %v475_v53, 7 }
 0x143   :  { %v535_v57 = vsel %vm193_vm1, %v529_v54, %v530_v55  ;;  %v516_v58 = vpop.f32.mrf.mxu1 }
 0x144   :  { %v542_v60 = vadd.f32 %v535_v57, %v526_v56  ;;  %v547_v61 = vrot.slane %v516_v58, 1 }
 0x145   :  { %v499_v14 = vpop.f32.mrf.mxu2 }
 0x146   :  { %v550_v63 = vsel %vm273_vm3, %v546_v59, %v547_v61  ;;  %v528_v20 = vadd.f32 %v778_v51, %v499_v14 }
 0x147   :  { %v554_v0 = vsel %vm1040_vm2, %v550_v63, 0.0 }
 0x148   :  { %v558_v1 = vadd.f32 %v554_v0, %v542_v60  ;;  %v478_v2 = vpop.f32.mrf.mxu3 }
 0x149   :  { %v531_v4 = vrot.slane %v478_v2, 7 }
 0x14a   :  { %v562_v5 = vmax.f32 %v558_v1, 0.0 }
 0x14b   :  { %v534_v7 = vsel %vm193_vm1, %v530_v55, %v531_v4  ;;  %v518_v8 = vpop.f32.mrf.mxu1 }
 0x14c   :  { %566 = vst [vmem:[%s1126_s5 + $0x8] sm:$0xff] %v562_v5  ;;  %v539_v9 = vsel %vm1052_vm5, %v534_v7, 0.0  ;;  %v548_v11 = vrot.slane %v518_v8, 1 }
 0x14d   :  { %v543_v13 = vadd.f32 %v539_v9, %v527_v6 }
 0x14e   :  { %v549_v3 = vsel %vm273_vm3, %v547_v61, %v548_v11  ;;  %v552_v21 = vsel %vm273_vm3, %v548_v11, %v545_v16 }
 0x14f   :  { %v559_v15 = vadd.f32 %v549_v3, %v543_v13  ;;  %v556_v26 = vsel %vm1072_vm6, %v552_v21, 0.0 }
 0x150   :  { %v480_v17 = vpop.f32.mrf.mxu3 }
 0x151   :  { %v563_v18 = vmax.f32 %v559_v15, 0.0  ;;  %v532_v19 = vrot.slane %v480_v17, 7 }
 0x153   :  { %567 = vst [vmem:[%s1126_s5 + $0x10] sm:$0xff] %v563_v18  ;;  %v533_v12 = vsel %vm193_vm1, %v531_v4, %v532_v19  ;;  %v536_v23 = vsel %vm193_vm1, %v532_v19, %v529_v54 }
 0x154   :  { %v537_v24 = vsel %vm1048_vm4, %v536_v23, 0.0  ;;  %v544_v25 = vadd.f32 %v533_v12, %v528_v20 }
 0x155   :  { %v541_v27 = vadd.f32 %v537_v24, %v525_v22 }
 0x156   :  { %v560_v29 = vadd.f32 %v556_v26, %v544_v25 }
 0x157   :  { %v557_v30 = vadd.f32 %v551_v28, %v541_v27 }
 0x158   :  { %v564_v31 = vmax.f32 %v560_v29, 0.0 }
 0x159   :  { %v561_v33 = vmax.f32 %v557_v30, 0.0 }
 0x15a   :  { %568 = vst [vmem:[%s1126_s5 + $0x18] sm:$0xff] %v564_v31 }
 0x15b   :  { %565 = vst [vmem:[%s1126_s5] sm:$0xff] %v561_v33 }

</bundles_post_ra>
